<compile_context>
chip_gen: v6e
topology: v6e:2x2x1
jax: 0.10.0
libtpu: 0.0.40
codegen_flags: <defaults>
</compile_context>

<pallas_src>
import jax
import jax.numpy as jnp
from jax.experimental import pallas as pl
from jax.experimental.pallas import tpu as pltpu


def _round_up(x, m):
    return (x + m - 1) // m * m


def _sublane_multiple(dtype):
    # Sub-32-bit dtypes pack along sublanes: f32 -> 8 rows, bf16 -> 16, int8 -> 32.
    itemsize = jnp.dtype(dtype).itemsize
    return 8 * max(1, 4 // itemsize)


def _vmem_capacity_bytes():
    try:
        info = pltpu.get_tpu_info()
        cap = getattr(info, "vmem_capacity_bytes", None)
        if cap:
            return int(cap)
    except Exception:
        pass
    return 64 * 1024 * 1024  # conservative: v7x per-TensorCore VMEM


def _feature_resizer_kernel(x_ref, w_ref, b_ref, g_ref, beta_ref, o_ref):
    # x_ref: (BM, C1) native dtype, w_ref: (C1, C2) native dtype,
    # b_ref/g_ref/beta_ref: (1, C2) f32, o_ref: (BM, C2).
    # Linear: MXU matmul in native operand dtype, f32 accumulation.
    y = jnp.dot(x_ref[...], w_ref[...], preferred_element_type=jnp.float32)
    y = y + b_ref[...]

    # LayerNorm(eps=1e-12) over the last axis, single pass: two cross-lane sums
    # (XLU) + one rsqrt (EUP).  Clamp variance at zero so f32 cancellation in
    # E[y^2] - mean^2 can never feed a negative value into rsqrt.
    c2 = y.shape[-1]
    inv_c2 = jnp.float32(1.0 / c2)
    mean = jnp.sum(y, axis=-1, keepdims=True) * inv_c2
    mean_sq = jnp.sum(y * y, axis=-1, keepdims=True) * inv_c2
    var = jnp.maximum(mean_sq - mean * mean, jnp.float32(0.0))
    inv_std = jax.lax.rsqrt(var + jnp.float32(1e-12))
    out = (y - mean) * inv_std * g_ref[...] + beta_ref[...]

    # Dropout: module evaluated in inference mode -> identity.
    # TODO(synk): training-mode dropout would need pltpu.prng_seed/prng_random_bits.
    o_ref[...] = out.astype(o_ref.dtype)


def feature_resizer(x, weight, bias, gamma, beta, *, block_m=None):
    """FeatureResizer forward (eval mode).

    x: (batch, seq, C1); weight: (C1, C2) == W_pt.T; bias/gamma/beta: (C2,).
    """
    batch, seq, c1 = x.shape
    c2 = weight.shape[1]
    n = batch * seq

    sub = _sublane_multiple(x.dtype)
    x_item = jnp.dtype(x.dtype).itemsize
    w_item = jnp.dtype(weight.dtype).itemsize

    # VMEM budget: physical capacity minus headroom for compiler scratch / sems.
    vmem_cap = _vmem_capacity_bytes()
    vmem_budget = max(vmem_cap - 16 * 1024 * 1024, 32 * 1024 * 1024)

    # Default row tile: 1024 on 128 MiB parts (v5e/v6e), 512 on 64 MiB parts (v7x).
    if block_m is None:
        block_m = 1024 if vmem_cap >= 128 * 1024 * 1024 else 512

    def vmem_est(bm_):
        return (
            2 * bm_ * c1 * x_item        # double-buffered x tiles
            + 2 * bm_ * c2 * x_item      # double-buffered out tiles
            + c1 * c2 * w_item           # weight (single-buffered, fetched once)
            + 3 * c2 * 4                 # bias / gamma / beta (f32, single-buffered)
            + 3 * bm_ * c2 * 4           # in-kernel f32 temporaries
        )

    # Row tile selection.
    bm = _round_up(min(block_m, n), sub)
    # Keep >= 2 grid steps when possible so the "parallel" axis can shard across
    # v7x's two TensorCores (per-step overhead ~0.35 us is negligible).
    if n >= 2 * sub:
        bm = min(bm, _round_up(pl.cdiv(n, 2), sub))
    # Shrink the row tile (never the feature dims) until the working set fits.
    while bm > sub and vmem_est(bm) > vmem_budget:
        bm = _round_up(pl.cdiv(bm, 2), sub)
    # A block never needs to exceed the row extent; full-extent blocks are always
    # legal even when n is not a sublane multiple.
    if bm >= n:
        bm = n

    grid = (pl.cdiv(n, bm),)  # edge block (if any): OOB rows read garbage, but
                              # their stores are masked, so the output is exact.

    x2d = x.reshape(n, c1)  # metadata-only reshape, no HBM copy
    # Cast small params to f32 once here (hoisted out of the per-step body).
    b2d = bias.astype(jnp.float32).reshape(1, c2)
    g2d = gamma.astype(jnp.float32).reshape(1, c2)
    bt2d = beta.astype(jnp.float32).reshape(1, c2)

    vmem_limit = int(min(vmem_budget, max(2 * vmem_est(bm), 32 * 1024 * 1024)))

    # Grid-invariant operands: constant index_map -> fetched once; single buffer.
    invariant = dict(pipeline_mode=pl.Buffered(1))

    out2d = pl.pallas_call(
        _feature_resizer_kernel,
        out_shape=jax.ShapeDtypeStruct((n, c2), x.dtype),
        grid_spec=pltpu.PrefetchScalarGridSpec(
            num_scalar_prefetch=0,
            grid=grid,
            in_specs=[
                pl.BlockSpec((bm, c1), lambda i: (i, 0)),
                pl.BlockSpec((c1, c2), lambda i: (0, 0), **invariant),
                pl.BlockSpec((1, c2), lambda i: (0, 0), **invariant),
                pl.BlockSpec((1, c2), lambda i: (0, 0), **invariant),
                pl.BlockSpec((1, c2), lambda i: (0, 0), **invariant),
            ],
            out_specs=pl.BlockSpec((bm, c2), lambda i: (i, 0)),
        ),
        compiler_params=pltpu.CompilerParams(
            dimension_semantics=("parallel",),
            vmem_limit_bytes=vmem_limit,
        ),
    )(x2d, weight, b2d, g2d, bt2d)

    return out2d.reshape(batch, seq, c2)


def _reference(x, weight, bias, gamma, beta):
    y = jnp.einsum("bsc,cd->bsd", x.astype(jnp.float32), weight.astype(jnp.float32))
    y = y + bias.astype(jnp.float32)
    mean = jnp.mean(y, axis=-1, keepdims=True)
    var = jnp.mean((y - mean) ** 2, axis=-1, keepdims=True)
    y = (y - mean) / jnp.sqrt(var + 1e-12)
    y = y * gamma.astype(jnp.float32) + beta.astype(jnp.float32)
    return y.astype(x.dtype)


if __name__ == "__main__":
    # Small shapes consistent with the module: batch=2, seq=8, C1=32, C2=64.
    batch, seq, c1, c2 = 2, 8, 32, 64

    key = jax.random.PRNGKey(0)
    k_x, k_w, k_b, k_g, k_beta = jax.random.split(key, 5)

    x = jax.random.normal(k_x, (batch, seq, c1), dtype=jnp.float32)

    # Deterministic synthetic parameters (shapes from nn.Linear / nn.LayerNorm).
    weight = jax.random.normal(k_w, (c1, c2), dtype=jnp.float32) * 0.02  # W_pt.T
    bias = jax.random.normal(k_b, (c2,), dtype=jnp.float32) * 0.01
    gamma = 1.0 + 0.1 * jax.random.normal(k_g, (c2,), dtype=jnp.float32)
    beta = 0.1 * jax.random.normal(k_beta, (c2,), dtype=jnp.float32)

    out = feature_resizer(x, weight, bias, gamma, beta)
    out = jax.block_until_ready(out)

    ref = _reference(x, weight, bias, gamma, beta)
    assert out.shape == (batch, seq, c2)
    assert jnp.allclose(out, ref, atol=1e-4, rtol=1e-4)

    print("KERNEL_OK")
</pallas_src>

<mosaic_0001>
module attributes {stable_mosaic.version = 11 : i64} {
  func.func @_feature_resizer_kernel(%arg0: i32, %arg1: memref<8x32xf32, #tpu.memory_space<vmem>>, %arg2: memref<32x64xf32, #tpu.memory_space<vmem>>, %arg3: memref<1x64xf32, #tpu.memory_space<vmem>>, %arg4: memref<1x64xf32, #tpu.memory_space<vmem>>, %arg5: memref<1x64xf32, #tpu.memory_space<vmem>>, %arg6: memref<8x64xf32, #tpu.memory_space<vmem>>) attributes {dimension_semantics = [#tpu.dimension_semantics<parallel>], iteration_bounds = array<i64: 2>, scalar_prefetch = 0 : i64, scratch_operands = 0 : i64, tpu.core_type = #tpu.core_type<tc>, window_params = [{transform_indices = @transform_0, window_bounds = array<i64: 8, 32>}, {pipeline_mode = #tpu.pipeline_mode<synchronous>, transform_indices = @transform_1, window_bounds = array<i64: 32, 64>}, {pipeline_mode = #tpu.pipeline_mode<synchronous>, transform_indices = @transform_2, window_bounds = array<i64: 1, 64>}, {pipeline_mode = #tpu.pipeline_mode<synchronous>, transform_indices = @transform_3, window_bounds = array<i64: 1, 64>}, {pipeline_mode = #tpu.pipeline_mode<synchronous>, transform_indices = @transform_4, window_bounds = array<i64: 1, 64>}, {transform_indices = @transform_5, window_bounds = array<i64: 8, 64>}]} {
    %c0 = arith.constant 0 : index
    %c0_0 = arith.constant 0 : index
    %0 = vector.load %arg1[%c0, %c0_0] : memref<8x32xf32, #tpu.memory_space<vmem>>, vector<8x32xf32>
    %c0_1 = arith.constant 0 : index
    %c0_2 = arith.constant 0 : index
    %1 = vector.load %arg2[%c0_1, %c0_2] : memref<32x64xf32, #tpu.memory_space<vmem>>, vector<32x64xf32>
    %cst = arith.constant dense<0.000000e+00> : vector<8x64xf32>
    %2 = tpu.matmul %0, %1, %cst {dimension_numbers = #tpu.dot_dimension_numbers<[1], [0], [0], [1], [0, 0, 1, 1], [], []>} : vector<8x32xf32>, vector<32x64xf32>, vector<8x64xf32> -> vector<8x64xf32>
    %c0_3 = arith.constant 0 : index
    %c0_4 = arith.constant 0 : index
    %3 = vector.load %arg3[%c0_3, %c0_4] : memref<1x64xf32, #tpu.memory_space<vmem>>, vector<1x64xf32>
    %4 = vector.broadcast %3 : vector<1x64xf32> to vector<8x64xf32>
    %5 = arith.addf %2, %4 : vector<8x64xf32>
    %cst_5 = arith.constant dense<0.000000e+00> : vector<8xf32>
    %6 = vector.multi_reduction <add>, %5, %cst_5 [1] : vector<8x64xf32> to vector<8xf32>
    %7 = vector.shape_cast %6 : vector<8xf32> to vector<8x1xf32>
    %cst_6 = arith.constant 1.562500e-02 : f32
    %8 = vector.broadcast %cst_6 : f32 to vector<8x1xf32>
    %9 = arith.mulf %7, %8 : vector<8x1xf32>
    %10 = arith.mulf %5, %5 : vector<8x64xf32>
    %cst_7 = arith.constant dense<0.000000e+00> : vector<8xf32>
    %11 = vector.multi_reduction <add>, %10, %cst_7 [1] : vector<8x64xf32> to vector<8xf32>
    %12 = vector.shape_cast %11 : vector<8xf32> to vector<8x1xf32>
    %cst_8 = arith.constant 1.562500e-02 : f32
    %13 = vector.broadcast %cst_8 : f32 to vector<8x1xf32>
    %14 = arith.mulf %12, %13 : vector<8x1xf32>
    %15 = arith.mulf %9, %9 : vector<8x1xf32>
    %16 = arith.subf %14, %15 : vector<8x1xf32>
    %cst_9 = arith.constant 0.000000e+00 : f32
    %17 = vector.broadcast %cst_9 : f32 to vector<8x1xf32>
    %18 = arith.maximumf %16, %17 : vector<8x1xf32>
    %cst_10 = arith.constant 9.99999996E-13 : f32
    %19 = vector.broadcast %cst_10 : f32 to vector<8x1xf32>
    %20 = arith.addf %18, %19 : vector<8x1xf32>
    %21 = math.rsqrt %20 : vector<8x1xf32>
    %22 = vector.broadcast %9 : vector<8x1xf32> to vector<8x64xf32>
    %23 = arith.subf %5, %22 : vector<8x64xf32>
    %24 = vector.broadcast %21 : vector<8x1xf32> to vector<8x64xf32>
    %25 = arith.mulf %23, %24 : vector<8x64xf32>
    %c0_11 = arith.constant 0 : index
    %c0_12 = arith.constant 0 : index
    %26 = vector.load %arg4[%c0_11, %c0_12] : memref<1x64xf32, #tpu.memory_space<vmem>>, vector<1x64xf32>
    %27 = vector.broadcast %26 : vector<1x64xf32> to vector<8x64xf32>
    %28 = arith.mulf %25, %27 : vector<8x64xf32>
    %c0_13 = arith.constant 0 : index
    %c0_14 = arith.constant 0 : index
    %29 = vector.load %arg5[%c0_13, %c0_14] : memref<1x64xf32, #tpu.memory_space<vmem>>, vector<1x64xf32>
    %30 = vector.broadcast %29 : vector<1x64xf32> to vector<8x64xf32>
    %31 = arith.addf %28, %30 : vector<8x64xf32>
    %c0_15 = arith.constant 0 : index
    %c0_16 = arith.constant 0 : index
    %32 = vector.load %arg6[%c0_15, %c0_16] : memref<8x64xf32, #tpu.memory_space<vmem>>, vector<8x64xf32>
    tpu.vector_store %arg6[%c0_15, %c0_16], %31 {strides = array<i32>} : memref<8x64xf32, #tpu.memory_space<vmem>>, vector<8x64xf32>,
    return
  }
  func.func @transform_0(%arg0: i32) -> (i32, i32) {
    %c0_i32 = arith.constant 0 : i32
    %c0_i32_0 = arith.constant 0 : i32
    return %arg0, %c0_i32 : i32, i32
  }
  func.func @transform_1(%arg0: i32) -> (i32, i32) {
    %c0_i32 = arith.constant 0 : i32
    %c0_i32_0 = arith.constant 0 : i32
    %c0_i32_1 = arith.constant 0 : i32
    return %c0_i32, %c0_i32_0 : i32, i32
  }
  func.func @transform_2(%arg0: i32) -> (i32, i32) {
    %c0_i32 = arith.constant 0 : i32
    %c0_i32_0 = arith.constant 0 : i32
    %c0_i32_1 = arith.constant 0 : i32
    return %c0_i32, %c0_i32_0 : i32, i32
  }
  func.func @transform_3(%arg0: i32) -> (i32, i32) {
    %c0_i32 = arith.constant 0 : i32
    %c0_i32_0 = arith.constant 0 : i32
    %c0_i32_1 = arith.constant 0 : i32
    return %c0_i32, %c0_i32_0 : i32, i32
  }
  func.func @transform_4(%arg0: i32) -> (i32, i32) {
    %c0_i32 = arith.constant 0 : i32
    %c0_i32_0 = arith.constant 0 : i32
    %c0_i32_1 = arith.constant 0 : i32
    return %c0_i32, %c0_i32_0 : i32, i32
  }
  func.func @transform_5(%arg0: i32) -> (i32, i32) {
    %c0_i32 = arith.constant 0 : i32
    %c0_i32_0 = arith.constant 0 : i32
    return %arg0, %c0_i32 : i32, i32
  }
}

</mosaic_0001>

<bundles_post_ra>
// kernel: tpu_custom_call.1
= control target key start
LH: loop header
LB: loop body
LE: loop exit
PB: predicated region body
PF: predicated region fallthrough
CT: control target
= control target key end

     0   :  { %10 = vsyncpa [#allocation3], 0  ;;  %s897_s0 = inlined_call_operand.hbm [shape: f32[16,32], index: 0, kind: input, shape index: {}]   ;;  %s898_s1 = inlined_call_operand.hbm [shape: f32[32,64], index: 1, kind: input, shape index: {}]   ;;  %s899_s2 = inlined_call_operand.vmem [shape: f32[1,64], index: 2, kind: input, shape index: {}]   ;;  %s900_s3 = inlined_call_operand.vmem [shape: f32[1,64], index: 3, kind: input, shape index: {}]   ;;  %s901_s4 = inlined_call_operand.vmem [shape: f32[1,64], index: 4, kind: input, shape index: {}]   ;;  %s902_s5 = inlined_call_operand.hbm [shape: f32[16,64], index: 5, kind: output, shape index: {}]  }
   0x1   :  { %12 = vsyncpa [#allocation3 + $0x1], 0 }
   0x2   :  { %13 = vsyncpa [#allocation6], 0 }
   0x3   :  { %14 = vsyncpa [#allocation4], 0 }
   0x4   :  { %16 = vsyncpa [#allocation4 + $0x1], 0  ;;  %s727_s18 = smov 0   ;;  %s729_s19 = smov 0  }
   0x5   :  { %s731_s20 = smov 0   ;;  %s733_s21 = smov 0  }
   0x6 LB: > { %s748_s22 = sadd.s32 4294967295, %s688_s21   ;;  %s469_s23 = sadd.s32 4294967294, %s688_s21   ;;  %s688_s21 = sphi %s733_s21, %s924_s21   ;;  %s684_s20 = sphi %s731_s20, %s923_s20   ;;  %s680_s19 = sphi %s729_s19, %s922_s19   ;;  %s676_s18 = sphi %s727_s18, %s921_s18  }
   0x7   : > { %p42_p0 = scmp.ne.s32.totalorder %s680_s19, %s676_s18  ;;  %p903_p1 = scmp.eq.s32.totalorder %s748_s22, 0 }
   0x8   : > { %p156_p3 = scmp.eq.s32.totalorder %s469_s23, 1  ;;  %p470_p5 = scmp.ge.s32.totalorder %s688_s21, 1 }
   0x9   : > { %p757_p4 = por %p903_p1, %p42_p0  ;;  %p163_p7 = scmp.lt.s32.totalorder %s688_s21, 3 }
   0xa   : > { %p762_p6 = por %p156_p3, %p42_p0  ;;  %s690_s27 = smov [#allocation5]  }
   0xb   : > { %s907_s24 = scalar_select %p757_p4, 1, 0 }
   0xc   : > { %s908_s25 = scalar_select %p762_p6, 1, 0 }
   0xd   : > { %p767_p8 = pnand %p470_p5, %p163_p7  ;;  %s175_s28 = sshll.u32 %s690_s27, 4  ;;  %s176_s28 = int_to_ptr.vmem [resolvable:$true] %s175_s28 }
   0xe   : > { %s781_s30 = sadd.s32 1, %s688_s21   ;;  %s29_s6 = sadd.s32 1, %s684_s20 }
   0xf   : > { %s909_s26 = scalar_select %p767_p8, 1, 0 }
  0x10   : > { %p511_p9 = pneg %p767_p8  ;;  %s26_s7 = ssub.s32 %s688_s21, %s781_s30 }
  0x11   : > { %s577_s8 = scalar_lea.vmem %s176_s28, 512  ;;  %p585_p5 = scmp.lt.s32.totalorder %s176_s28, %s176_s28 }
  0x12   : > { %p776_p11 = pnand %p511_p9, %p903_p1  ;;  %p578_p13 = scmp.ne.s32.totalorder %s176_s28, %s577_s8 }
  0x13   : > { %p586_p7 = scmp.lt.s32.totalorder %s577_s8, %s577_s8 }
  0x14   : > { %p568_p12 = pneg %p776_p11 }
  0x15   : > { %p587_p10 = por %p586_p7, %p585_p5 }
  0x16   : > { %p580_p0 = pnand %p578_p13, %p568_p12 }
  0x18   : > { %p581_p3 = pneg %p580_p0 }
  0x1a   : > { %p588_p2 = pnand %p587_p10, %p581_p3 }
  0x1c   : > { %591 = shalt.err (!%p588_p2)
}
  0x1d   : > { %s691_s9 = smov 128   ;;  %s692_s10 = smov 8  }
  0x1e   : > { %514 = dma.hbm_to_vmem [thread:$0]  (!%p776_p11), %s898_s1, 512, %s176_s28, [#allocation6], %s691_s9, %s691_s9, %s692_s10  }
  0x1f   : > { %p27_p9 = scmp.eq.s32.totalorder %s26_s7, 0  ;;  %p36_p12 = scmp.ne.s32.totalorder %s684_s20, %s680_s19 }
  0x20   : > { %p37_p10 = scmp.eq.s32.totalorder %s688_s21, 0  ;;  %p524_p2 = scmp.lt.s32.totalorder %s688_s21, 2 }
  0x21   : > { %s798_s13 = scalar_select %p27_p9, %s684_s20, %s29_s6  }
  0x22   : > { %p38_p13 = por %p37_p10, %p36_p12  ;;  %p911_p0 = scmp.eq.s32.totalorder %s748_s22, 1 }
  0x23   : > { %s198_s15 = sand.u32 1, %s684_s20   ;;  %s474_s16 = sshll.u32 %s688_s21, 7 }
  0x24   : > { %p802_p3 = por %p911_p0, %p36_p12  ;;  %s473_s17 = sshll.u32 %s198_s15, 3 }
  0x25   : > { %s811_s29 = scalar_lea.hbm %s897_s0, %s474_s16  ;;  %s202_s28 = scalar_lea.vmem [#allocation2], %s473_s17 }
  0x26   : > { %s912_s14 = scalar_select %p802_p3, 1, 0 }
  0x27   : > { %s209_s6 = sshll.u32 %s202_s28, 4  ;;  %p813_p11 = pnand %p524_p2, %p38_p13  ;;  %s210_s6 = int_to_ptr.vmem [resolvable:$true] %s209_s6 }
  0x28   : > { %s199_s8 = scalar_lea.sflag [#allocation3], %s198_s15  ;;  %s592_s9 = scalar_lea.hbm %s811_s29, 128 }
  0x29   : > { %p593_p5 = scmp.ne.s32.totalorder %s811_s29, %s592_s9  ;;  %p594_p7 = pneg %p813_p11 }
  0x2a   : > { %s597_s12 = scalar_lea.hbm %s897_s0, 256  ;;  %p598_p10 = scmp.lt.s32.totalorder %s811_s29, %s897_s0 }
  0x2b   : > { %p595_p9 = pnand %p594_p7, %p593_p5  ;;  %p599_p2 = scmp.lt.s32.totalorder %s597_s12, %s592_s9 }
  0x2d   : > { %p596_p12 = pneg %p595_p9  ;;  %p600_p13 = por %p599_p2, %p598_p10 }
  0x2f   : > { %p601_p0 = pnand %p600_p13, %p596_p12 }
  0x31   : > { %604 = shalt.err (!%p601_p0)
}
  0x32   : > { %s605_s23 = scalar_lea.vmem %s210_s6, 128  ;;  %s693_s15 = smov [#allocation2]  }
  0x33   : > { %p606_p1 = scmp.ne.s32.totalorder %s210_s6, %s605_s23  ;;  %s610_s27 = sshll.u32 %s693_s15, 4  ;;  %s611_s27 = int_to_ptr.vmem [resolvable:$false] %s610_s27 }
  0x34   : > { %s612_s28 = scalar_lea.vmem %s611_s27, 256  ;;  %p613_p5 = scmp.lt.s32.totalorder %s210_s6, %s611_s27 }
  0x35   : > { %p608_p6 = pnand %p606_p1, %p594_p7  ;;  %p614_p9 = scmp.lt.s32.totalorder %s612_s28, %s605_s23 }
  0x37   : > { %p609_p3 = pneg %p608_p6  ;;  %p615_p4 = por %p614_p9, %p613_p5 }
  0x39   : > { %p616_p8 = pnand %p615_p4, %p609_p3 }
  0x3b   : > { %619 = shalt.err (!%p616_p8)
}
  0x3c   : > { %518 = dma.hbm_to_vmem [thread:$0]  (!%p813_p11), %s811_s29, 128, %s210_s6, %s199_s8  }
  0x3d   : > { %p914_p12 = scmp.ne.s32.totalorder %s909_s26, 0 }
  0x3e   : > { %s834_s9 = sand.u32 (!%p914_p12), 1, %s680_s19   ;;  %p915_p1 = scmp.ne.s32.totalorder (!%p914_p12), %s907_s24, 0 }
  0x3f   : > { %218 = sbr.rel (%p914_p12) target bundleno = 460 (0x1cc), region = 40  ;;  %s476_s10 = sshll.u32 (!%p914_p12), %s834_s9, 3 }
  0x40   : > { %s221_s11 = scalar_lea.sflag (!%p914_p12), [#allocation3], %s834_s9  ;;  %s224_s12 = scalar_lea.vmem (!%p914_p12), [#allocation2], %s476_s10 }
  0x44   : > { %663 = dma.done.wait (%p915_p1), %s221_s11, 128  }
  0x45   : > { %665 = vsyncadd (%p915_p1), %s221_s11, 4294967168  ;;  %p916_p4 = scmp.eq.s32.totalorder %s748_s22, 0 }
  0x47   : > { %667 = dma.done.wait (%p916_p4), [#allocation6], 512   ;;  %p917_p6 = pmov %p916_p4 }
  0x48   : > { %v694_v0 = vmov 0.0   ;;  %vm695_vm0 = vmmov 0   ;;  %v259_v1 = vld [vmem:[#allocation5 + $0x18] sm:$0xff]  ;;  %v258_v2 = vld [vmem:[#allocation5 + $0x10] sm:$0xff]  ;;  %v257_v3 = vld [vmem:[#allocation5 + $0x8] sm:$0xff]  ;;  %vm267_vm1 = vcmask 261120  }
  0x49   : > { %669 = vsyncadd (%p917_p6), [#allocation6], 4294966784  ;;  %492 = vmatprep.subr.mxu0 %v694_v0  ;;  %500 = vmatprep.mubr.msk.f32.mxu0 %vm695_vm0, %v694_v0  ;;  %v256_v4 = vld [vmem:[#allocation5] sm:$0xff]  ;;  %v255_v5 = vld [vmem:[%s224_s12] sm:$0xff]  ;;  %vm341_vm2 = vcmask 523264   ;;  %s484_s16 = sshll.u32 %s748_s22, 7 }
  0x4a   : > { %493 = vmatpush3.msra.mxu0 %v259_v1  ;;  %v479_v6 = vld [vmem:[%s899_s2] ss:$0 sm:$0xff]  ;;  %s254_s17 = scalar_lea.vmem [#allocation7], %s476_s10  ;;  %s387_s28 = scalar_lea.hbm %s902_s5, %s484_s16 }
  0x4b   : > { %494 = vmatprep.subr.mxu0 %v694_v0  ;;  %v481_v23 = vld [vmem:[%s900_s3] ss:$0 sm:$0xff]  ;;  %s389_s23 = sshll.u32 %s254_s17, 4  ;;  %s376_s11 = scalar_lea.sflag [#allocation4], %s834_s9  ;;  %s390_s23 = int_to_ptr.vmem [resolvable:$true] %s389_s23 }
  0x4c   : > { %495 = vmatpush3.msra.mxu0 %v258_v2  ;;  %v482_v25 = vld [vmem:[%s901_s4] ss:$0 sm:$0xff]  ;;  %s620_s12 = scalar_lea.vmem %s390_s23, 128  ;;  %p918_p3 = scmp.ne.s32.totalorder %s912_s14, 0 }
  0x4d   : > { %496 = vmatprep.subr.mxu0 %v694_v0  ;;  %p621_p8 = scmp.ne.s32.totalorder %s390_s23, %s620_s12  ;;  %s696_s24 = smov [#allocation7]  }
  0x4e   : > { %497 = vmatpush3.msra.mxu0 %v257_v3  ;;  %s624_s22 = sshll.u32 %s696_s24, 4  ;;  %s625_s22 = int_to_ptr.vmem [resolvable:$false] %s624_s22 }
  0x4f   : > { %498 = vmatprep.subr.mxu0 %v694_v0  ;;  %p622_p11 = pnand %p621_p8, %p918_p3  ;;  %s626_s10 = scalar_lea.vmem %s625_s22, 256 }
  0x50   : > { %499 = vmatpush3.msra.mxu0 %v256_v4  ;;  %p627_p10 = scmp.lt.s32.totalorder %s390_s23, %s625_s22  ;;  %p628_p2 = scmp.lt.s32.totalorder %s626_s10, %s620_s12 }
  0x51   : > { %501 = vmatmul.mubr.msk.f32.vlgmr.msra.gmra.mxu0 %vm267_vm1, %v255_v5  ;;  %p623_p7 = pneg %p622_p11 }
  0x52   : > { %p629_p13 = por %p628_p2, %p627_p10 }
  0x54   : > { %p630_p0 = pnand %p629_p13, %p623_p7 }
 0x111   : > { %v337_v7 = vpop.f32.mrf.mxu0 }
 0x112   : > { %v338_v8 = vadd.f32 %v479_v6, %v337_v7 }
 0x113   : > { %v502_v9 = vpop.f32.mrf.mxu0 }
 0x114   : > { %v342_v10 = vsel %vm341_vm2, %v338_v8, 0.0  ;;  %v346_v11 = vmul.f32 %v338_v8, %v338_v8 }
 0x115   : > { %343 = vadd.xlane.f32.xlu0 %v342_v10 }
 0x116   : > { %v347_v12 = vsel %vm341_vm2, %v346_v11, 0.0 }
 0x119   : > { %348 = vadd.xlane.f32.xlu0 %v347_v12 }
 0x19e   : > { %v344_v13 = vpop.xlane.xlu0 %343 }
 0x19f   : > { %v345_v14 = vmul.f32 0.015625, %v344_v13 }
 0x1a1   : > { %v351_v16 = vmul.f32 %v345_v14, %v345_v14  ;;  %v356_v21 = vsub.f32 %v338_v8, %v345_v14 }
 0x1a2   : > { %v349_v15 = vpop.xlane.xlu0 %348 }
 0x1a3   : > { %v350_v17 = vmul.f32 0.015625, %v349_v15 }
 0x1a5   : > { %v352_v18 = vsub.f32 %v350_v17, %v351_v16 }
 0x1a7   : > { %v353_v19 = vmax.f32 %v352_v18, 0.0 }
 0x1a9   : > { %v354_v20 = vadd.f32 1e-12, %v353_v19 }
 0x1ab   : > { %564 = vrsqrt.f32 %v354_v20 }
 0x1b8   : > { %v565_v22 = vpop.eup %564 }
 0x1b9   : > { %v357_v24 = vmul.f32 %v565_v22, %v356_v21 }
 0x1bb   : > { %v365_v26 = vmul.f32 %v481_v23, %v357_v24 }
 0x1bd   : > { %v373_v27 = vadd.f32 %v482_v25, %v365_v26 }
 0x1bf   : > { %374 = vst.msk [vmem:[%s254_s17] sm:$0xff] %vm341_vm2, %v373_v27 }
 0x1c0   : > { %633 = shalt.err (!%p630_p0)
}
 0x1c1   : > { %s634_s26 = scalar_lea.hbm %s387_s28, 128  ;;  %s638_s6 = scalar_lea.hbm %s902_s5, 256 }
 0x1c2   : > { %p635_p5 = scmp.ne.s32.totalorder %s387_s28, %s634_s26  ;;  %p639_p1 = scmp.lt.s32.totalorder %s387_s28, %s902_s5 }
 0x1c3   : > { %p640_p4 = scmp.lt.s32.totalorder %s638_s6, %s634_s26 }
 0x1c4   : > { %p636_p9 = pnand %p635_p5, %p918_p3 }
 0x1c5   : > { %p641_p6 = por %p640_p4, %p639_p1 }
 0x1c6   : > { %p637_p12 = pneg %p636_p9 }
 0x1c8   : > { %p642_p8 = pnand %p641_p6, %p637_p12 }
 0x1ca   : > { %645 = shalt.err (!%p642_p8)
}
 0x1cb   : > { %509 = dma.vmem_to_hbm [thread:$0]  (%p918_p3), %s390_s23, 128, %s387_s28, %s376_s11  }
 0x1cc PF: > { %s401_s16 = sand.u32 1, %s676_s18   ;;  %p919_p11 = scmp.ne.s32.totalorder %s908_s25, 0 }
 0x1cd   : > { %p920_p7 = scmp.ge.s32.totalorder %s688_s21, 2  ;;  %s402_s17 = scalar_lea.sflag [#allocation4], %s401_s16 }
 0x1cf   : > { %p520_p10 = pnand %p920_p7, %p919_p11 }
 0x1d1   : > { %p521_p2 = pneg %p520_p10 }
 0x1d3   : > { %671 = dma.done.wait (%p521_p2), %s402_s17, 128  }
 0x1d4   : > { %673 = vsyncadd (%p521_p2), %s402_s17, 4294967168  ;;  %p19_p13 = scmp.ge.s32.totalorder %s781_s30, 4   ;;  %s921_s18 = smov %s680_s19 }
 0x1d5   : > { %s922_s19 = smov %s684_s20  ;;  %s923_s20 = smov %s798_s13 }
 0x1d6   : > { %s924_s21 = smov %s781_s30  ;;  %21 = sbr.rel (!%p19_p13) target bundleno = 6 (0x6), region = 89 }
 0x1db   :  { %407 = vsyncpa [#allocation3], 1 }
 0x1dc   :  { %409 = vsyncpa [#allocation3 + $0x1], 1 }
 0x1dd   :  { %410 = vsyncpa [#allocation6], 1 }
 0x1de   :  { %411 = vsyncpa [#allocation4], 1 }
 0x1df   :  { %413 = vsyncpa [#allocation4 + $0x1], 1 }

</bundles_post_ra>
